<compile_context>
chip_gen: v7x
topology: tpu7x:2x2x1
jax: 0.10.0
libtpu: 0.0.40
codegen_flags: <defaults>
</compile_context>

<pallas_src>
import math
from functools import partial

import jax
import jax.numpy as jnp
from jax import lax
from jax.experimental import pallas as pl
from jax.experimental.pallas import tpu as pltpu

_VMEM_LIMIT = 64 * 1024 * 1024


# ----------------------------------------------------------------------------
# tiling helper
# ----------------------------------------------------------------------------
def _pick_tile(dim, cap, aligns=(128, 8)):
    """Largest tile <= cap that is a multiple of one of `aligns` (tried in
    order) and evenly divides `dim`; falls back to the full dimension (always
    a legal block)."""
    if dim <= cap:
        return dim
    for align in aligns:
        start = cap - (cap % align)
        for t in range(start, 0, -align):
            if dim % t == 0:
                return t
    return dim


# ----------------------------------------------------------------------------
# Kernel 1: (optional pre-LayerNorm) + matmul + bias      out = LN(x) @ Wt + b
#   LN is computed once per row tile (j == 0) into a bf16 VMEM scratch and
#   reused for every N tile.
# ----------------------------------------------------------------------------
def _ln_matmul_kernel(x_ref, a_ref, b_ref, wt_ref, bias_ref, o_ref, xn_ref,
                      *, eps, apply_ln):
    @pl.when(pl.program_id(1) == 0)
    def _():
        x = x_ref[...].astype(jnp.float32)
        if apply_ln:
            hdim = x.shape[-1]
            mean = jnp.mean(x, axis=-1, keepdims=True)
            d = x - mean
            # torch.Tensor.std is unbiased (N-1); the module adds eps to std.
            std = jnp.sqrt(jnp.sum(d * d, axis=-1, keepdims=True) / (hdim - 1))
            x = a_ref[...] * d / (std + eps) + b_ref[...]
        xn_ref[...] = x.astype(jnp.bfloat16)

    y = jnp.dot(xn_ref[...], wt_ref[...], preferred_element_type=jnp.float32)
    o_ref[...] = (y + bias_ref[...]).astype(o_ref.dtype)


def ln_matmul(x, alpha, beta, wt, bias, *, apply_ln, eps=1e-6,
              out_dtype=jnp.float32):
    """x: (M, K) f32, wt: (K, N) pre-transposed bf16, bias: (N,) f32."""
    M, K = x.shape
    N = wt.shape[1]
    tm = _pick_tile(M, 256, (128, 8))
    tn = _pick_tile(N, 512, (128,))
    grid = (M // tm, N // tn)
    return pl.pallas_call(
        partial(_ln_matmul_kernel, eps=eps, apply_ln=apply_ln),
        out_shape=jax.ShapeDtypeStruct((M, N), out_dtype),
        grid=grid,
        in_specs=[
            pl.BlockSpec((tm, K), lambda i, j: (i, 0)),
            pl.BlockSpec((1, K), lambda i, j: (0, 0)),
            pl.BlockSpec((1, K), lambda i, j: (0, 0)),
            pl.BlockSpec((K, tn), lambda i, j: (0, j)),
            pl.BlockSpec((1, tn), lambda i, j: (0, j)),
        ],
        out_specs=pl.BlockSpec((tm, tn), lambda i, j: (i, j)),
        scratch_shapes=[pltpu.VMEM((tm, K), jnp.bfloat16)],
        compiler_params=pltpu.CompilerParams(
            dimension_semantics=("parallel", "arbitrary"),
            vmem_limit_bytes=_VMEM_LIMIT),
    )(x, alpha.reshape(1, K), beta.reshape(1, K), wt, bias.reshape(1, N))


# ----------------------------------------------------------------------------
# Kernel 2: multi-head attention + single output projection + residual
#   grid = (B, q_tiles); per-head contexts are written into a (tq, H) bf16 VMEM
#   scratch at lane column h*head_dim, then one (tq,H)@(H,H) projection matmul.
#   1/sqrt(d_k) is folded into the Q projection weights.
# ----------------------------------------------------------------------------
def _mha_kernel(*refs, n_heads, head_dim, q_off, k_off, v_off, shared, tq):
    if shared:
        src_ref, mask_ref, owt_ref, ob_ref, res_ref, o_ref, ctx_ref = refs
        q_src = kv_src = src_ref
        r0 = pl.multiple_of(pl.program_id(1) * tq, 8)   # q-row offset in block
    else:
        q_src, kv_src, mask_ref, owt_ref, ob_ref, res_ref, o_ref, ctx_ref = refs
        r0 = 0

    valid = mask_ref[0] != 0                            # (tq, Sk), shared by heads

    for h in range(n_heads):
        c = h * head_dim
        qh = q_src[0, pl.ds(r0, tq), q_off + c:q_off + c + head_dim]   # (tq, hd)
        kh = kv_src[0, :, k_off + c:k_off + c + head_dim]              # (Sk, hd)
        vh = kv_src[0, :, v_off + c:v_off + c + head_dim]              # (Sk, hd)

        logits = lax.dot_general(qh, kh, (((1,), (1,)), ((), ())),
                                 preferred_element_type=jnp.float32)   # (tq, Sk)
        logits = jnp.where(valid, logits, jnp.float32(-1e9))
        logits = logits - jnp.max(logits, axis=-1, keepdims=True)
        p = jnp.exp(logits)
        p = p * pl.reciprocal(jnp.sum(p, axis=-1, keepdims=True), approx=True)

        oh = jnp.dot(p.astype(jnp.bfloat16), vh,
                     preferred_element_type=jnp.float32)               # (tq, hd)
        ctx_ref[:, c:c + head_dim] = oh.astype(jnp.bfloat16)

    proj = jnp.dot(ctx_ref[...], owt_ref[...],
                   preferred_element_type=jnp.float32)                 # (tq, H)
    o_ref[...] = (res_ref[0] + proj + ob_ref[...])[None, ...].astype(o_ref.dtype)


def fused_mha(q_src, kv_src, mask, o_wt, o_b, residual, *, n_heads, head_dim,
              q_off, k_off, v_off, shared):
    """q_src: (B,Sq,Wq) bf16; kv_src: (B,Sk,Wkv) bf16 (None if shared=True);
    mask: (B,Sq,Sk) int8; o_wt: (H,H) bf16 pre-transposed; residual: (B,Sq,H)
    f32 -> (B,Sq,H) f32."""
    B, Sq, H = residual.shape
    Sk = q_src.shape[1] if shared else kv_src.shape[1]
    Wq = q_src.shape[2]
    tq = _pick_tile(Sq, 256, (128, 8))
    grid = (B, Sq // tq)

    mask_spec = pl.BlockSpec((1, tq, Sk), lambda b, qi: (b, qi, 0))
    owt_spec = pl.BlockSpec((H, H), lambda b, qi: (0, 0))
    ob_spec = pl.BlockSpec((1, H), lambda b, qi: (0, 0))
    res_spec = pl.BlockSpec((1, tq, H), lambda b, qi: (b, qi, 0))

    if shared:
        in_specs = [pl.BlockSpec((1, Sq, Wq), lambda b, qi: (b, 0, 0)),
                    mask_spec, owt_spec, ob_spec, res_spec]
        args = (q_src, mask, o_wt, o_b.reshape(1, H), residual)
    else:
        Wkv = kv_src.shape[2]
        in_specs = [pl.BlockSpec((1, tq, Wq), lambda b, qi: (b, qi, 0)),
                    pl.BlockSpec((1, Sk, Wkv), lambda b, qi: (b, 0, 0)),
                    mask_spec, owt_spec, ob_spec, res_spec]
        args = (q_src, kv_src, mask, o_wt, o_b.reshape(1, H), residual)

    return pl.pallas_call(
        partial(_mha_kernel, n_heads=n_heads, head_dim=head_dim,
                q_off=q_off, k_off=k_off, v_off=v_off, shared=shared, tq=tq),
        out_shape=jax.ShapeDtypeStruct((B, Sq, H), jnp.float32),
        grid=grid,
        in_specs=in_specs,
        out_specs=pl.BlockSpec((1, tq, H), lambda b, qi: (b, qi, 0)),
        scratch_shapes=[pltpu.VMEM((tq, H), jnp.bfloat16)],
        compiler_params=pltpu.CompilerParams(
            dimension_semantics=("parallel", "parallel"),
            vmem_limit_bytes=_VMEM_LIMIT),
    )(*args)


# ----------------------------------------------------------------------------
# Kernel 3: pre-LN + dense1 + ReLU + dense2 + residual (K-tiled intermediate)
#   LN computed once per row tile (j == 0) into a bf16 VMEM scratch.
# ----------------------------------------------------------------------------
def _ln_ffn_kernel(x_ref, a_ref, b_ref, w1t_ref, b1_ref, w2t_ref, b2_ref,
                   o_ref, acc_ref, xn_ref, *, eps):
    j = pl.program_id(1)

    @pl.when(j == 0)
    def _():
        x = x_ref[...].astype(jnp.float32)
        hdim = x.shape[-1]
        mean = jnp.mean(x, axis=-1, keepdims=True)
        d = x - mean
        std = jnp.sqrt(jnp.sum(d * d, axis=-1, keepdims=True) / (hdim - 1))
        xn_ref[...] = (a_ref[...] * d / (std + eps) + b_ref[...]).astype(jnp.bfloat16)
        acc_ref[...] = jnp.zeros_like(acc_ref)

    h = jnp.dot(xn_ref[...], w1t_ref[...],
                preferred_element_type=jnp.float32) + b1_ref[...]
    h = jnp.maximum(h, 0.0)
    acc_ref[...] += jnp.dot(h.astype(jnp.bfloat16), w2t_ref[...],
                            preferred_element_type=jnp.float32)

    @pl.when(j == pl.num_programs(1) - 1)
    def _():
        o_ref[...] = (acc_ref[...] + b2_ref[...]
                      + x_ref[...].astype(jnp.float32)).astype(o_ref.dtype)


def ln_ffn_residual(x, alpha, beta, w1t, b1, w2t, b2, *, eps=1e-6):
    """out = x + dense2(relu(dense1(LN(x)))).  x: (M, H) f32, weights bf16."""
    M, H = x.shape
    I = w1t.shape[1]
    tm = _pick_tile(M, 256, (128, 8))
    ti = _pick_tile(I, 512, (128,))
    grid = (M // tm, I // ti)
    return pl.pallas_call(
        partial(_ln_ffn_kernel, eps=eps),
        out_shape=jax.ShapeDtypeStruct((M, H), jnp.float32),
        grid=grid,
        in_specs=[
            pl.BlockSpec((tm, H), lambda i, j: (i, 0)),   # x (also the residual)
            pl.BlockSpec((1, H), lambda i, j: (0, 0)),    # alpha
            pl.BlockSpec((1, H), lambda i, j: (0, 0)),    # beta
            pl.BlockSpec((H, ti), lambda i, j: (0, j)),   # w1^T tile (bf16)
            pl.BlockSpec((1, ti), lambda i, j: (0, j)),   # b1 tile
            pl.BlockSpec((ti, H), lambda i, j: (j, 0)),   # w2^T tile (bf16)
            pl.BlockSpec((1, H), lambda i, j: (0, 0)),    # b2
        ],
        out_specs=pl.BlockSpec((tm, H), lambda i, j: (i, 0)),
        scratch_shapes=[pltpu.VMEM((tm, H), jnp.float32),
                        pltpu.VMEM((tm, H), jnp.bfloat16)],
        compiler_params=pltpu.CompilerParams(
            dimension_semantics=("parallel", "arbitrary"),
            vmem_limit_bytes=_VMEM_LIMIT),
    )(x, alpha.reshape(1, H), beta.reshape(1, H), w1t, b1.reshape(1, I),
      w2t, b2.reshape(1, H))


# ----------------------------------------------------------------------------
# Module composition
# ----------------------------------------------------------------------------
def prepare_params(p, n_heads):
    """Pre-transpose / pre-fuse / pre-cast all weights ONCE.
    torch (N,K) layouts -> (K,N) bf16 slabs; 1/sqrt(d_k) folded into Q proj."""
    sa, ca = p["self_attn"], p["cross_attn"]
    hidden = p["n1_a"].shape[0]
    scale = 1.0 / math.sqrt(hidden // n_heads)
    bf = lambda a: a.astype(jnp.bfloat16)
    return dict(
        sa_qkv_wt=bf(jnp.concatenate([sa["q_w"] * scale, sa["k_w"], sa["v_w"]],
                                     axis=0).T),
        sa_qkv_b=jnp.concatenate([sa["q_b"] * scale, sa["k_b"], sa["v_b"]], axis=0),
        sa_o_wt=bf(sa["o_w"].T), sa_o_b=sa["o_b"],
        ca_q_wt=bf(ca["q_w"].T * scale), ca_q_b=ca["q_b"] * scale,
        ca_kv_wt=bf(jnp.concatenate([ca["k_w"], ca["v_w"]], axis=0).T),
        ca_kv_b=jnp.concatenate([ca["k_b"], ca["v_b"]], axis=0),
        ca_o_wt=bf(ca["o_w"].T), ca_o_b=ca["o_b"],
        ff_w1t=bf(p["ff_w1"].T), ff_b1=p["ff_b1"],
        ff_w2t=bf(p["ff_w2"].T), ff_b2=p["ff_b2"],
        n1_a=p["n1_a"], n1_b=p["n1_b"],
        n2_a=p["n2_a"], n2_b=p["n2_b"],
        n3_a=p["n3_a"], n3_b=p["n3_b"],
    )


def _compress_mask(mask, B, Sq, Sk):
    """Broadcast a (b?,1,q?,Sk) module mask over batch only (never heads) and
    compress to int8 (4x less HBM/VMEM than int32)."""
    m = jnp.broadcast_to(mask, (B, 1, Sq, Sk)).reshape(B, Sq, Sk)
    return (m != 0).astype(jnp.int8)


def decoder_layer(prep, inp, mask, enc_out, enc_mask, n_heads):
    # TODO(synk): dropout layers are stochastic in train mode; treated as identity (eval).
    B, S, H = inp.shape
    Se = enc_out.shape[1]
    hd = H // n_heads
    M, Me = B * S, B * Se

    self_mask = _compress_mask(mask, B, S, S)
    cross_mask = _compress_mask(enc_mask, B, S, Se)

    # ---- self attention -----------------------------------------------------
    qkv = ln_matmul(inp.reshape(M, H), prep["n1_a"], prep["n1_b"],
                    prep["sa_qkv_wt"], prep["sa_qkv_b"], apply_ln=True,
                    out_dtype=jnp.bfloat16).reshape(B, S, 3 * H)
    x = fused_mha(qkv, None, self_mask, prep["sa_o_wt"], prep["sa_o_b"], inp,
                  n_heads=n_heads, head_dim=hd, q_off=0, k_off=H, v_off=2 * H,
                  shared=True)

    # ---- cross attention ----------------------------------------------------
    q = ln_matmul(x.reshape(M, H), prep["n2_a"], prep["n2_b"],
                  prep["ca_q_wt"], prep["ca_q_b"], apply_ln=True,
                  out_dtype=jnp.bfloat16).reshape(B, S, H)
    kv = ln_matmul(enc_out.reshape(Me, H), prep["n2_a"], prep["n2_b"],
                   prep["ca_kv_wt"], prep["ca_kv_b"], apply_ln=False,
                   out_dtype=jnp.bfloat16).reshape(B, Se, 2 * H)
    x = fused_mha(q, kv, cross_mask, prep["ca_o_wt"], prep["ca_o_b"], x,
                  n_heads=n_heads, head_dim=hd, q_off=0, k_off=0, v_off=H,
                  shared=False)

    # ---- feed-forward -------------------------------------------------------
    out = ln_ffn_residual(x.reshape(M, H), prep["n3_a"], prep["n3_b"],
                          prep["ff_w1t"], prep["ff_b1"],
                          prep["ff_w2t"], prep["ff_b2"])
    return out.reshape(B, S, H)


# ----------------------------------------------------------------------------
# Pure-JAX reference (mirrors the PyTorch forward) for a sanity check
# ----------------------------------------------------------------------------
def _ref_layernorm(x, a, b, eps=1e-6):
    mean = x.mean(-1, keepdims=True)
    std = jnp.sqrt(((x - mean) ** 2).sum(-1, keepdims=True) / (x.shape[-1] - 1))
    return a * (x - mean) / (std + eps) + b


def _ref_mha(p, q, k, v, mask, n_heads):
    B, Sq, H = q.shape
    Sk = k.shape[1]
    hd = H // n_heads
    qp = q @ p["q_w"].T + p["q_b"]
    kp = k @ p["k_w"].T + p["k_b"]
    vp = v @ p["v_w"].T + p["v_b"]
    qr = qp.reshape(B, Sq, n_heads, hd).transpose(0, 2, 1, 3)
    kr = kp.reshape(B, Sk, n_heads, hd).transpose(0, 2, 1, 3)
    vr = vp.reshape(B, Sk, n_heads, hd).transpose(0, 2, 1, 3)
    logits = qr @ kr.transpose(0, 1, 3, 2) / math.sqrt(hd)
    logits = jnp.where(mask == 0, -1e9, logits)
    attn = jax.nn.softmax(logits, axis=-1)
    s = (attn @ vr).transpose(0, 2, 1, 3).reshape(B, Sq, H)
    return s @ p["o_w"].T + p["o_b"]


def _ref_decoder(params, inp, mask, enc_out, enc_mask, n_heads):
    xn1 = _ref_layernorm(inp, params["n1_a"], params["n1_b"])
    x = inp + _ref_mha(params["self_attn"], xn1, xn1, xn1, mask, n_heads)
    xn2 = _ref_layernorm(x, params["n2_a"], params["n2_b"])
    x = x + _ref_mha(params["cross_attn"], xn2, enc_out, enc_out, enc_mask, n_heads)
    xn3 = _ref_layernorm(x, params["n3_a"], params["n3_b"])
    h = jnp.maximum(xn3 @ params["ff_w1"].T + params["ff_b1"], 0.0)
    return x + h @ params["ff_w2"].T + params["ff_b2"]


# ----------------------------------------------------------------------------
# Deterministic parameter init + driver
# ----------------------------------------------------------------------------
def init_params(key, hidden, intermediate):
    ks = jax.random.split(key, 32)
    it = iter(range(32))

    def lin(n_out, n_in):
        return (0.02 * jax.random.normal(ks[next(it)], (n_out, n_in), jnp.float32),
                0.02 * jax.random.normal(ks[next(it)], (n_out,), jnp.float32))

    def mha():
        qw, qb = lin(hidden, hidden)
        kw, kb = lin(hidden, hidden)
        vw, vb = lin(hidden, hidden)
        ow, ob = lin(hidden, hidden)
        return dict(q_w=qw, q_b=qb, k_w=kw, k_b=kb, v_w=vw, v_b=vb, o_w=ow, o_b=ob)

    w1, b1 = lin(intermediate, hidden)
    w2, b2 = lin(hidden, intermediate)
    return dict(
        self_attn=mha(), cross_attn=mha(),
        ff_w1=w1, ff_b1=b1, ff_w2=w2, ff_b2=b2,
        n1_a=jnp.ones(hidden), n1_b=jnp.zeros(hidden),
        n2_a=jnp.ones(hidden), n2_b=jnp.zeros(hidden),
        n3_a=jnp.ones(hidden), n3_b=jnp.zeros(hidden),
    )


if __name__ == "__main__":
    B, S, S_ENC, HIDDEN, N_HEADS, INTER = 2, 8, 8, 32, 4, 2048

    root = jax.random.PRNGKey(0)
    k_p, k_x, k_e = jax.random.split(root, 3)
    params = init_params(k_p, HIDDEN, INTER)
    prep = prepare_params(params, N_HEADS)      # weights pre-fused/transposed/bf16 once

    inp = jax.random.normal(k_x, (B, S, HIDDEN), jnp.float32)
    enc_out = jax.random.normal(k_e, (B, S_ENC, HIDDEN), jnp.float32)

    # causal self-attention mask (1,1,S,S); full-visibility encoder mask (B,1,1,S_enc)
    self_mask = jnp.tril(jnp.ones((S, S), jnp.int32)).reshape(1, 1, S, S)
    enc_mask = jnp.ones((B, 1, 1, S_ENC), jnp.int32)

    out = decoder_layer(prep, inp, self_mask, enc_out, enc_mask, N_HEADS)
    out = jax.block_until_ready(out)

    ref = _ref_decoder(params, inp, self_mask, enc_out, enc_mask, N_HEADS)
    assert out.shape == (B, S, HIDDEN)
    assert jnp.allclose(out, ref, atol=2e-3, rtol=2e-3), "mismatch vs reference"

    print("KERNEL_OK")
</pallas_src>

<mosaic_0001>
module attributes {stable_mosaic.version = 11 : i64} {
  func.func @_ln_matmul_kernel(%arg0: i32, %arg1: i32, %arg2: memref<16x32xf32, #tpu.memory_space<vmem>>, %arg3: memref<1x32xf32, #tpu.memory_space<vmem>>, %arg4: memref<1x32xf32, #tpu.memory_space<vmem>>, %arg5: memref<32x96xbf16, #tpu.memory_space<vmem>>, %arg6: memref<1x96xf32, #tpu.memory_space<vmem>>, %arg7: memref<16x96xbf16, #tpu.memory_space<vmem>>, %arg8: memref<16x32xbf16, #tpu.memory_space<vmem>>) attributes {dimension_semantics = [#tpu.dimension_semantics<parallel>, #tpu.dimension_semantics<arbitrary>], iteration_bounds = array<i64: 1, 1>, scalar_prefetch = 0 : i64, scratch_operands = 1 : i64, tpu.core_type = #tpu.core_type<tc>, window_params = [{transform_indices = @transform_0, window_bounds = array<i64: 16, 32>}, {pipeline_mode = #tpu.pipeline_mode<synchronous>, transform_indices = @transform_1, window_bounds = array<i64: 1, 32>}, {pipeline_mode = #tpu.pipeline_mode<synchronous>, transform_indices = @transform_2, window_bounds = array<i64: 1, 32>}, {transform_indices = @transform_3, window_bounds = array<i64: 32, 96>}, {transform_indices = @transform_4, window_bounds = array<i64: 1, 96>}, {transform_indices = @transform_5, window_bounds = array<i64: 16, 96>}]} {
    %c0_i32 = arith.constant 0 : i32
    %0 = arith.cmpi eq, %arg1, %c0_i32 : i32
    %1 = arith.extui %0 : i1 to i32
    %c0_i32_0 = arith.constant 0 : i32
    %2 = arith.cmpi ne, %1, %c0_i32_0 : i32
    scf.if %2 {
      %c0_8 = arith.constant 0 : index
      %c0_9 = arith.constant 0 : index
      %11 = vector.load %arg2[%c0_8, %c0_9] : memref<16x32xf32, #tpu.memory_space<vmem>>, vector<16x32xf32>
      %cst_10 = arith.constant dense<0.000000e+00> : vector<16xf32>
      %12 = vector.multi_reduction <add>, %11, %cst_10 [1] : vector<16x32xf32> to vector<16xf32>
      %13 = vector.shape_cast %12 : vector<16xf32> to vector<16x1xf32>
      %cst_11 = arith.constant 3.200000e+01 : f32
      %14 = vector.broadcast %cst_11 : f32 to vector<16x1xf32>
      %15 = arith.divf %13, %14 : vector<16x1xf32>
      %16 = vector.broadcast %15 : vector<16x1xf32> to vector<16x32xf32>
      %17 = arith.subf %11, %16 : vector<16x32xf32>
      %18 = arith.mulf %17, %17 : vector<16x32xf32>
      %cst_12 = arith.constant dense<0.000000e+00> : vector<16xf32>
      %19 = vector.multi_reduction <add>, %18, %cst_12 [1] : vector<16x32xf32> to vector<16xf32>
      %20 = vector.shape_cast %19 : vector<16xf32> to vector<16x1xf32>
      %cst_13 = arith.constant 3.100000e+01 : f32
      %21 = vector.broadcast %cst_13 : f32 to vector<16x1xf32>
      %22 = arith.divf %20, %21 : vector<16x1xf32>
      %23 = math.sqrt %22 : vector<16x1xf32>
      %c0_14 = arith.constant 0 : index
      %c0_15 = arith.constant 0 : index
      %24 = vector.load %arg3[%c0_14, %c0_15] : memref<1x32xf32, #tpu.memory_space<vmem>>, vector<1x32xf32>
      %25 = vector.broadcast %24 : vector<1x32xf32> to vector<16x32xf32>
      %26 = arith.mulf %25, %17 : vector<16x32xf32>
      %cst_16 = arith.constant 9.99999997E-7 : f32
      %27 = vector.broadcast %cst_16 : f32 to vector<16x1xf32>
      %28 = arith.addf %23, %27 : vector<16x1xf32>
      %29 = vector.broadcast %28 : vector<16x1xf32> to vector<16x32xf32>
      %30 = arith.divf %26, %29 : vector<16x32xf32>
      %c0_17 = arith.constant 0 : index
      %c0_18 = arith.constant 0 : index
      %31 = vector.load %arg4[%c0_17, %c0_18] : memref<1x32xf32, #tpu.memory_space<vmem>>, vector<1x32xf32>
      %32 = vector.broadcast %31 : vector<1x32xf32> to vector<16x32xf32>
      %33 = arith.addf %30, %32 : vector<16x32xf32>
      %34 = arith.truncf %33 : vector<16x32xf32> to vector<16x32xbf16>
      %c0_19 = arith.constant 0 : index
      %c0_20 = arith.constant 0 : index
      %35 = vector.load %arg8[%c0_19, %c0_20] : memref<16x32xbf16, #tpu.memory_space<vmem>>, vector<16x32xbf16>
      tpu.vector_store %arg8[%c0_19, %c0_20], %34 {strides = array<i32>} : memref<16x32xbf16, #tpu.memory_space<vmem>>, vector<16x32xbf16>,
    } else {
    }
    %c0 = arith.constant 0 : index
    %c0_1 = arith.constant 0 : index
    %3 = vector.load %arg8[%c0, %c0_1] : memref<16x32xbf16, #tpu.memory_space<vmem>>, vector<16x32xbf16>
    %c0_2 = arith.constant 0 : index
    %c0_3 = arith.constant 0 : index
    %4 = vector.load %arg5[%c0_2, %c0_3] : memref<32x96xbf16, #tpu.memory_space<vmem>>, vector<32x96xbf16>
    %cst = arith.constant dense<0.000000e+00> : vector<16x96xf32>
    %5 = tpu.matmul %3, %4, %cst {dimension_numbers = #tpu.dot_dimension_numbers<[1], [0], [0], [1], [0, 0, 1, 1], [], []>} : vector<16x32xbf16>, vector<32x96xbf16>, vector<16x96xf32> -> vector<16x96xf32>
    %c0_4 = arith.constant 0 : index
    %c0_5 = arith.constant 0 : index
    %6 = vector.load %arg6[%c0_4, %c0_5] : memref<1x96xf32, #tpu.memory_space<vmem>>, vector<1x96xf32>
    %7 = vector.broadcast %6 : vector<1x96xf32> to vector<16x96xf32>
    %8 = arith.addf %5, %7 : vector<16x96xf32>
    %9 = arith.truncf %8 : vector<16x96xf32> to vector<16x96xbf16>
    %c0_6 = arith.constant 0 : index
    %c0_7 = arith.constant 0 : index
    %10 = vector.load %arg7[%c0_6, %c0_7] : memref<16x96xbf16, #tpu.memory_space<vmem>>, vector<16x96xbf16>
    tpu.vector_store %arg7[%c0_6, %c0_7], %9 {strides = array<i32>} : memref<16x96xbf16, #tpu.memory_space<vmem>>, vector<16x96xbf16>,
    return
  }
  func.func @transform_0(%arg0: i32, %arg1: i32) -> (i32, i32) {
    %c0_i32 = arith.constant 0 : i32
    %c0_i32_0 = arith.constant 0 : i32
    return %arg0, %c0_i32 : i32, i32
  }
  func.func @transform_1(%arg0: i32, %arg1: i32) -> (i32, i32) {
    %c0_i32 = arith.constant 0 : i32
    %c0_i32_0 = arith.constant 0 : i32
    %c0_i32_1 = arith.constant 0 : i32
    return %c0_i32, %c0_i32_0 : i32, i32
  }
  func.func @transform_2(%arg0: i32, %arg1: i32) -> (i32, i32) {
    %c0_i32 = arith.constant 0 : i32
    %c0_i32_0 = arith.constant 0 : i32
    %c0_i32_1 = arith.constant 0 : i32
    return %c0_i32, %c0_i32_0 : i32, i32
  }
  func.func @transform_3(%arg0: i32, %arg1: i32) -> (i32, i32) {
    %c0_i32 = arith.constant 0 : i32
    %c0_i32_0 = arith.constant 0 : i32
    return %c0_i32, %arg1 : i32, i32
  }
  func.func @transform_4(%arg0: i32, %arg1: i32) -> (i32, i32) {
    %c0_i32 = arith.constant 0 : i32
    %c0_i32_0 = arith.constant 0 : i32
    return %c0_i32, %arg1 : i32, i32
  }
  func.func @transform_5(%arg0: i32, %arg1: i32) -> (i32, i32) {
    %c0_i32 = arith.constant 0 : i32
    return %arg0, %arg1 : i32, i32
  }
}

</mosaic_0001>

<bundles_post_ra>
// kernel: tpu_custom_call.1
= control target key start
LH: loop header
LB: loop body
LE: loop exit
PB: predicated region body
PF: predicated region fallthrough
CT: control target
= control target key end

     0   :  { %10 = vsyncpa [#allocation4], 0  ;;  %s568_s0 = inlined_call_operand.hbm [shape: f32[16,32], index: 0, kind: input, shape index: {}]   ;;  %s569_s1 = inlined_call_operand.hbm [shape: f32[1,32], index: 1, kind: input, shape index: {}]   ;;  %s570_s2 = inlined_call_operand.hbm [shape: f32[1,32], index: 2, kind: input, shape index: {}]   ;;  %s571_s3 = inlined_call_operand.hbm [shape: bf16[32,96], index: 3, kind: input, shape index: {}]   ;;  %s572_s4 = inlined_call_operand.hbm [shape: f32[1,96], index: 4, kind: input, shape index: {}]   ;;  %s573_s5 = inlined_call_operand.hbm [shape: bf16[16,96], index: 5, kind: output, shape index: {}]  }
   0x1   :  { %11 = vsyncpa [#allocation7], 0 }
   0x2   :  { %12 = vsyncpa [#allocation10], 0 }
   0x3   :  { %13 = vsyncpa [#allocation5], 0  ;;  %s435_s18 = smov [#allocation6]   ;;  %s436_s20 = smov [#allocation9]  }
   0x4   :  { %s32_s19 = sshll.u32 %s435_s18, 4  ;;  %s51_s21 = sshll.u32 %s436_s20, 4  ;;  %s33_s19 = int_to_ptr.vmem [resolvable:$true] %s32_s19  ;;  %s477_s21 = int_to_ptr.vmem [resolvable:$true] %s51_s21 }
   0x5   :  { %s295_s24 = scalar_lea.hbm %s569_s1, 16 }
   0x6   :  { %p296_p0 = scmp.ne.s32.totalorder %s569_s1, %s295_s24  ;;  %p299_p1 = scmp.lt.u32.totalorder %s295_s24, %s569_s1 }
   0x8   :  { %p301_p2 = pnand %p299_p1, %p296_p0 }
   0xa   :  { %304 = shalt.err (!%p301_p2)
}
   0xb   :  { %s305_s29 = scalar_lea.vmem %s33_s19, 16  ;;  %s309_s30 = scalar_lea.vmem %s33_s19, 32 }
   0xc   :  { %p306_p3 = scmp.ne.s32.totalorder %s33_s19, %s305_s29  ;;  %p310_p4 = scmp.lt.s32.totalorder %s33_s19, %s33_s19 }
   0xd   :  { %p311_p5 = scmp.lt.s32.totalorder %s309_s30, %s305_s29 }
   0xf   :  { %p312_p6 = por %p311_p5, %p310_p4 }
  0x11   :  { %p313_p7 = pnand %p312_p6, %p306_p3 }
  0x13   :  { %316 = shalt.err (!%p313_p7)
}
  0x14   :  { %35 = dma.hbm_to_vmem [thread:$0]  %s569_s1, 16, %s33_s19, [#allocation7]  }
  0x15   :  { %s317_s10 = scalar_lea.hbm %s571_s3, 256 }
  0x16   :  { %p318_p8 = scmp.ne.s32.totalorder %s571_s3, %s317_s10  ;;  %p321_p9 = scmp.lt.u32.totalorder %s317_s10, %s571_s3 }
  0x18   :  { %p323_p10 = pnand %p321_p9, %p318_p8 }
  0x1a   :  { %326 = shalt.err (!%p323_p10)
}
  0x1b   :  { %s327_s15 = scalar_lea.vmem %s477_s21, 256  ;;  %p332_p12 = scmp.lt.s32.totalorder %s477_s21, %s477_s21 }
  0x1c   :  { %p328_p11 = scmp.ne.s32.totalorder %s477_s21, %s327_s15  ;;  %p333_p13 = scmp.lt.s32.totalorder %s327_s15, %s327_s15 }
  0x1e   :  { %p334_p0 = por %p333_p13, %p332_p12 }
  0x20   :  { %p335_p1 = pnand %p334_p0, %p328_p11 }
  0x22   :  { %338 = shalt.err (!%p335_p1)
}
  0x23   :  { %s437_s1 = smov 64   ;;  %s438_s16 = smov 4  }
  0x24   :  { %57 = dma.hbm_to_vmem [thread:$0]  %s571_s3, 256, %s477_s21, [#allocation10], %s437_s1, %s437_s1, %s438_s16  }
  0x25   :  { %s439_s19 = smov [#allocation3]   ;;  %s339_s24 = scalar_lea.hbm %s568_s0, 256 }
  0x26   :  { %s19_s20 = sshll.u32 %s439_s19, 4  ;;  %p340_p2 = scmp.ne.s32.totalorder %s568_s0, %s339_s24  ;;  %s20_s20 = int_to_ptr.vmem [resolvable:$true] %s19_s20 }
  0x27   :  { %p343_p3 = scmp.lt.u32.totalorder %s339_s24, %s568_s0 }
  0x29   :  { %p345_p4 = pnand %p343_p3, %p340_p2 }
  0x2b   :  { %348 = shalt.err (!%p345_p4)
}
  0x2c   :  { %s349_s29 = scalar_lea.vmem %s20_s20, 256  ;;  %p354_p6 = scmp.lt.s32.totalorder %s20_s20, %s20_s20 }
  0x2d   :  { %p350_p5 = scmp.ne.s32.totalorder %s20_s20, %s349_s29  ;;  %p355_p7 = scmp.lt.s32.totalorder %s349_s29, %s349_s29 }
  0x2f   :  { %p356_p8 = por %p355_p7, %p354_p6 }
  0x31   :  { %p357_p9 = pnand %p356_p8, %p350_p5 }
  0x33   :  { %360 = shalt.err (!%p357_p9)
}
  0x34   :  { %s440_s3 = smov 128   ;;  %s441_s21 = smov 8  }
  0x35   :  { %25 = dma.hbm_to_vmem [thread:$0]  %s568_s0, 256, %s20_s20, [#allocation4], %s440_s3, %s440_s3, %s441_s21  }
  0x36   :  { %s442_s7 = smov [#allocation8]   ;;  %s443_s9 = smov [#allocation11]  }
  0x37   :  { %s42_s8 = sshll.u32 %s442_s7, 4  ;;  %s64_s10 = sshll.u32 %s443_s9, 4  ;;  %s43_s8 = int_to_ptr.vmem [resolvable:$true] %s42_s8  ;;  %s65_s10 = int_to_ptr.vmem [resolvable:$true] %s64_s10 }
  0x38   :  { %s361_s13 = scalar_lea.hbm %s570_s2, 16 }
  0x39   :  { %p362_p10 = scmp.ne.s32.totalorder %s570_s2, %s361_s13  ;;  %p365_p11 = scmp.lt.u32.totalorder %s361_s13, %s570_s2 }
  0x3b   :  { %p367_p12 = pnand %p365_p11, %p362_p10 }
  0x3d   :  { %370 = shalt.err (!%p367_p12)
}
  0x3e   :  { %s371_s0 = scalar_lea.vmem %s43_s8, 16  ;;  %s375_s19 = scalar_lea.vmem %s43_s8, 32 }
  0x3f   :  { %p372_p13 = scmp.ne.s32.totalorder %s43_s8, %s371_s0  ;;  %p376_p0 = scmp.lt.s32.totalorder %s43_s8, %s43_s8 }
  0x40   :  { %p377_p1 = scmp.lt.s32.totalorder %s375_s19, %s371_s0 }
  0x42   :  { %p378_p2 = por %p377_p1, %p376_p0 }
  0x44   :  { %p379_p3 = pnand %p378_p2, %p372_p13 }
  0x46   :  { %382 = shalt.err (!%p379_p3)
}
  0x47   :  { %45 = dma.hbm_to_vmem [thread:$0]  %s570_s2, 16, %s43_s8, [#allocation7]  }
  0x48   :  { %s383_s25 = scalar_lea.hbm %s572_s4, 16 }
  0x49   :  { %p384_p4 = scmp.ne.s32.totalorder %s572_s4, %s383_s25  ;;  %p387_p5 = scmp.lt.u32.totalorder %s383_s25, %s572_s4 }
  0x4b   :  { %p389_p6 = pnand %p387_p5, %p384_p4 }
  0x4d   :  { %392 = shalt.err (!%p389_p6)
}
  0x4e   :  { %s393_s3 = scalar_lea.vmem %s65_s10, 16  ;;  %s397_s21 = scalar_lea.vmem %s65_s10, 32 }
  0x4f   :  { %p394_p7 = scmp.ne.s32.totalorder %s65_s10, %s393_s3  ;;  %p398_p8 = scmp.lt.s32.totalorder %s65_s10, %s65_s10 }
  0x50   :  { %p399_p9 = scmp.lt.s32.totalorder %s397_s21, %s393_s3 }
  0x52   :  { %p400_p10 = por %p399_p9, %p398_p8 }
  0x54   :  { %p401_p11 = pnand %p400_p10, %p394_p7 }
  0x56   :  { %404 = shalt.err (!%p401_p11)
}
  0x57   :  { %67 = dma.hbm_to_vmem [thread:$0]  %s572_s4, 16, %s65_s10, [#allocation10]  }
  0x58   :  { %427 = dma.done.wait [#allocation4], 256  }
  0x59   :  { %428 = vsyncadd [#allocation4], 4294967040 }
  0x5a   :  { %429 = dma.done.wait [#allocation7], 32  }
  0x5b   :  { %430 = vsyncadd [#allocation7], 4294967264 }
  0x5c   :  { %431 = dma.done.wait [#allocation10], 272  }
  0x5d   :  { %432 = vsyncadd [#allocation10], 4294967024  ;;  %vm90_vm0 = vcmask 261120   ;;  %v88_v0 = vld [vmem:[#allocation3] sm:$0xff]  ;;  %v89_v1 = vld [vmem:[#allocation3 + $0x8] sm:$0xff]  ;;  %v444_v15 = vmov 0.0  }
  0x5e   :  { %v91_v2 = vsel %vm90_vm0, %v88_v0, 0.0  ;;  %v94_v3 = vsel %vm90_vm0, %v89_v1, 0.0  ;;  %v285_v14 = vld [vmem:[#allocation9] sm:$0xff]   ;;  %265 = vmatprep.subr.bf16.mxu0 %v444_v15  ;;  %v286_v16 = vld [vmem:[#allocation9 + $0x8] sm:$0xff]   ;;  %vm445_vm1 = vmmov 0   ;;  %vm230_vm6 = vcmask 781312  }
  0x5f   :  { %92 = vadd.xlane.f32.xlu0 %v91_v2  ;;  %266 = vmatpush3.bf16.msra.mxu0 %v285_v14  ;;  %v252_v33 = vld [vmem:[#allocation6] ss:$0 sm:$0xff]  ;;  %v253_v39 = vld [vmem:[#allocation8] ss:$0 sm:$0xff]  ;;  %v254_v45 = vld [vmem:[#allocation11] ss:$0 sm:$0xff] }
  0x60   :  { %269 = vmatprep.mubr.msk.bf16.mxu0 %vm445_vm1, %v444_v15  ;;  %267 = vmatprep.subr.bf16.mxu0 %v444_v15  ;;  %s446_s4 = smov [#allocation12]  }
  0x61   :  { %s238_s6 = sshll.u32 %s446_s4, 4  ;;  %s239_s6 = int_to_ptr.vmem [resolvable:$true] %s238_s6 }
  0x62   :  { %s405_s7 = scalar_lea.vmem %s239_s6, 128  ;;  %p410_p13 = scmp.lt.s32.totalorder %s239_s6, %s239_s6 }
  0x63   :  { %95 = vadd.xlane.f32.xlu0 %v94_v3  ;;  %268 = vmatpush3.bf16.msra.mxu0 %v286_v16  ;;  %p406_p12 = scmp.ne.s32.totalorder %s239_s6, %s405_s7  ;;  %p411_p0 = scmp.lt.s32.totalorder %s405_s7, %s405_s7 }
  0x65   :  { %p412_p1 = por %p411_p0, %p410_p13 }
  0x67   :  { %p413_p2 = pnand %p412_p1, %p406_p12 }
  0xec   :  { %v93_v4 = vpop.xlane.xlu0 %92 }
  0xed   :  { %v98_v5 = vmul.f32 0.03125, %v93_v4 }
  0xef   :  { %v100_v6 = vsub.f32 %v88_v0, %v98_v5 }
  0xf0   :  { %v96_v7 = vpop.xlane.xlu0 %95 }
  0xf1   :  { %v99_v8 = vmul.f32 0.03125, %v96_v7  ;;  %v102_v9 = vmul.f32 %v100_v6, %v100_v6  ;;  %v134_v35 = vmul.f32 %v252_v33, %v100_v6 }
  0xf3   :  { %v101_v10 = vsub.f32 %v89_v1, %v99_v8  ;;  %v104_v11 = vsel %vm90_vm0, %v102_v9, 0.0 }
  0xf4   :  { %105 = vadd.xlane.f32.xlu1 %v104_v11 }
  0xf5   :  { %v103_v12 = vmul.f32 %v101_v10, %v101_v10  ;;  %v135_v36 = vmul.f32 %v252_v33, %v101_v10 }
  0xf7   :  { %v107_v13 = vsel %vm90_vm0, %v103_v12, 0.0 }
  0xf8   :  { %108 = vadd.xlane.f32.xlu1 %v107_v13 }
 0x181   :  { %v106_v17 = vpop.xlane.xlu1 %105 }
 0x182   :  { %v111_v18 = vmul.f32 0.032258064, %v106_v17 }
 0x184   :  { %287 = vrsqrt.f32 %v111_v18  ;;  %vm115_vm2 = vcmp.eq.f32.partialorder %v111_v18, inf  ;;  %v118_v23 = vand.u32 2147483648, %v111_v18  ;;  %vm117_vm3 = vcmp.eq.f32.partialorder %v111_v18, 0.0 }
 0x185   :  { %v109_v19 = vpop.xlane.xlu1 %108 }
 0x186   :  { %v112_v20 = vmul.f32 0.032258064, %v109_v19 }
 0x188   :  { %289 = vrsqrt.f32 %v112_v20  ;;  %vm122_vm4 = vcmp.eq.f32.partialorder %v112_v20, inf  ;;  %v125_v29 = vand.u32 2147483648, %v112_v20  ;;  %vm124_vm5 = vcmp.eq.f32.partialorder %v112_v20, 0.0 }
 0x18e   :  { %v288_v21 = vpop.eup %287 }
 0x18f   :  { %v114_v22 = vmul.f32 %v288_v21, %v111_v18 }
 0x191   :  { %v116_v24 = vsel %vm115_vm2, %v111_v18, %v114_v22 }
 0x192   :  { %v290_v25 = vpop.eup %289  ;;  %v119_v26 = vsel %vm117_vm3, %v118_v23, %v116_v24 }
 0x193   :  { %v136_v27 = vadd.f32 1e-06, %v119_v26  ;;  %v121_v28 = vmul.f32 %v290_v25, %v112_v20 }
 0x195   :  { %291 = vrcp.f32 %v136_v27  ;;  %v123_v30 = vsel %vm122_vm4, %v112_v20, %v121_v28 }
 0x196   :  { %v126_v31 = vsel %vm124_vm5, %v125_v29, %v123_v30 }
 0x197   :  { %v137_v32 = vadd.f32 1e-06, %v126_v31 }
 0x199   :  { %293 = vrcp.f32 %v137_v32 }
 0x19f   :  { %v292_v34 = vpop.eup %291 }
 0x1a0   :  { %v139_v37 = vmul.f32 %v292_v34, %v134_v35 }
 0x1a2   :  { %v149_v41 = vadd.f32 %v253_v39, %v139_v37 }
 0x1a3   :  { %v294_v38 = vpop.eup %293 }
 0x1a4   :  { %v141_v40 = vmul.f32 %v294_v38, %v135_v36 }
 0x1a6   :  { %v150_v42 = vadd.f32 %v253_v39, %v141_v40 }
 0x1a8   :  { %v151_v43 = vpack.c.bf16 %v150_v42, %v149_v41 }
 0x1aa   :  { %152 = vst.msk [vmem:[#allocation2] sm:$0xff] %vm90_vm0, %v151_v43 }
 0x1b1   :  { %v153_v44 = vld [vmem:[#allocation2] sm:$0xff] }
 0x1b2   :  { %270 = vmatmul.mubr.msk.bf16.vlgmr.msra.gmra.mrb[0].mxu0 %vm90_vm0, %v153_v44 }
 0x285   :  { %v215_v46 = vpop.f32.mrb[0].mxu0 }
 0x286   :  { %v216_v47 = vadd.f32 %v254_v45, %v215_v46  ;;  %v271_v48 = vpop.f32.mrb[1].mxu0 }
 0x287   :  { %v218_v49 = vpop.f32.mrb[2].mxu0 }
 0x288   :  { %v260_v50 = vpack.c.bf16 %v216_v47, %v216_v47  ;;  %v219_v51 = vadd.f32 %v254_v45, %v218_v49  ;;  %v272_v52 = vpop.f32.mrb[3].mxu0 }
 0x28a   :  { %v261_v53 = vpack.c.bf16 %v219_v51, %v219_v51  ;;  %231 = vst.msk [vmem:[#allocation12] sm:$0xf] %vm230_vm6, %v260_v50 }
 0x28c   :  { %232 = vst.msk [vmem:[#allocation12 + $0x4] sm:$0xf] %vm230_vm6, %v261_v53 }
 0x28d   :  { %416 = shalt.err (!%p413_p2)
}
 0x28e   :  { %s417_s10 = scalar_lea.hbm %s573_s5, 128 }
 0x28f   :  { %p418_p3 = scmp.ne.s32.totalorder %s573_s5, %s417_s10  ;;  %p421_p4 = scmp.lt.u32.totalorder %s417_s10, %s573_s5 }
 0x291   :  { %p423_p5 = pnand %p421_p4, %p418_p3 }
 0x293   :  { %426 = shalt.err (!%p423_p5)
}
 0x294   :  { %244 = dma.vmem_to_hbm [thread:$0]  %s239_s6, 128, %s573_s5, [#allocation5], %s437_s1, %s437_s1, %s438_s16  }
 0x295   :  { %433 = dma.done.wait [#allocation5], 128  }
 0x296   :  { %434 = vsyncadd [#allocation5], 4294967168 }
 0x297   :  { %248 = vsyncpa [#allocation4], 1 }
 0x298   :  { %249 = vsyncpa [#allocation7], 1 }
 0x299   :  { %250 = vsyncpa [#allocation10], 1 }
 0x29a   :  { %251 = vsyncpa [#allocation5], 1 }

</bundles_post_ra>
